<compile_context>
chip_gen: v7x
topology: tpu7x:2x2x1
jax: 0.10.0
libtpu: 0.0.40
codegen_flags: <defaults>
</compile_context>

<pallas_src>
import jax
import jax.numpy as jnp
from jax.experimental import pallas as pl
from jax.experimental.pallas import tpu as pltpu


def _conv1x1_kernel(w_ref, x_ref, o_ref):
    # w_ref: (tco, Cin)   x_ref: (1, Cin, HW)   o_ref: (1, tco, HW)
    # Single full-K matmul; f32 accumulation on the MXU, direct store.
    o_ref[0] = jnp.dot(
        w_ref[...], x_ref[0], preferred_element_type=jnp.float32
    ).astype(o_ref.dtype)
    # TODO(synk): optionally cast operands to bf16 (keep f32 accumulation) for
    # v6e/v7x MXU peak; kept fp32 here to preserve the 1e-4 parity check.


def conv2d_1x1(x_nchw, w2d):
    """1x1 conv, stride 1, no bias. x: (N, Cin, H, W); w2d: (Cout, Cin)."""
    N, Cin, H, W = x_nchw.shape
    Cout = w2d.shape[0]
    HW = H * W

    # Free reshape for NCHW layout (no transpose, no extra HBM pass).
    x3d = x_nchw.reshape(N, Cin, HW)

    # Split Cout so there are >=2 parallel tiles (megacore on v7x); Cout=256.
    tco = 128 if (Cout % 128 == 0 and Cout >= 256) else Cout

    itemsize = x_nchw.dtype.itemsize
    cost = pl.CostEstimate(
        flops=2 * N * Cout * Cin * HW,
        transcendentals=0,
        bytes_accessed=(x3d.size + w2d.size + N * Cout * HW) * itemsize,
    )

    y3d = pl.pallas_call(
        _conv1x1_kernel,
        out_shape=jax.ShapeDtypeStruct((N, Cout, HW), x_nchw.dtype),
        grid_spec=pltpu.PrefetchScalarGridSpec(
            num_scalar_prefetch=0,
            grid=(N, Cout // tco),
            in_specs=[
                # Weight tile: (tco, Cin) — small, re-fetched on the fast axis.
                pl.BlockSpec((tco, Cin), lambda n, j: (j, 0)),
                # Activation: full (Cin, HW) slab for batch n (HW is the full
                # extent, so non-multiple-of-128 spatial sizes are fine).
                pl.BlockSpec((1, Cin, HW), lambda n, j: (n, 0, 0)),
            ],
            out_specs=pl.BlockSpec((1, tco, HW), lambda n, j: (n, j, 0)),
        ),
        compiler_params=pltpu.CompilerParams(
            dimension_semantics=("parallel", "parallel"),
            vmem_limit_bytes=32 * 1024 * 1024,
        ),
        cost_estimate=cost,
    )(w2d, x3d)

    # Free reshape back to NCHW.
    return y3d.reshape(N, Cout, H, W)


class MPallas:
    """Pallas equivalent of PyTorch M: Conv2d(1024, 256, kernel_size=1, bias=False)."""

    def __init__(self, key):
        Cout, Cin = 256, 1024
        bound = (1.0 / Cin) ** 0.5  # kaiming-uniform-like scale
        self.weight = jax.random.uniform(
            key, (Cout, Cin, 1, 1), dtype=jnp.float32, minval=-bound, maxval=bound
        )
        # Pre-flattened weight, computed once (no per-call reshape/transpose).
        self.w2d = self.weight.reshape(Cout, Cin)

    def __call__(self, x):
        return conv2d_1x1(x, self.w2d)


if __name__ == "__main__":
    key = jax.random.PRNGKey(0)
    k_w, k_x = jax.random.split(key)
    model = MPallas(k_w)

    # Small test shape (Cin is fixed at 1024 by the conv itself).
    x = jax.random.normal(k_x, (2, 1024, 8, 8), dtype=jnp.float32)
    y = jax.block_until_ready(model(x))
    ref = jax.lax.conv_general_dilated(
        x, model.weight, window_strides=(1, 1), padding="VALID",
        dimension_numbers=("NCHW", "OIHW", "NCHW"),
    )
    assert y.shape == (2, 256, 8, 8), y.shape
    assert jnp.allclose(y, ref, atol=1e-4, rtol=1e-4)

    # Also verify the module's nominal shape (1, 1024, 28, 28): HW = 784 is not
    # a multiple of 128 and is handled by the full-extent last block dim.
    x2 = jax.random.normal(k_x, (1, 1024, 28, 28), dtype=jnp.float32)
    y2 = jax.block_until_ready(model(x2))
    ref2 = jax.lax.conv_general_dilated(
        x2, model.weight, window_strides=(1, 1), padding="VALID",
        dimension_numbers=("NCHW", "OIHW", "NCHW"),
    )
    assert y2.shape == (1, 256, 28, 28), y2.shape
    assert jnp.allclose(y2, ref2, atol=1e-4, rtol=1e-4)

    print("KERNEL_OK")
</pallas_src>

<mosaic_0001>
module attributes {stable_mosaic.version = 11 : i64} {
  func.func @_conv1x1_kernel(%arg0: i32, %arg1: i32, %arg2: memref<128x1024xf32, #tpu.memory_space<vmem>>, %arg3: memref<1x1024x64xf32, #tpu.memory_space<vmem>>, %arg4: memref<1x128x64xf32, #tpu.memory_space<vmem>>) attributes {dimension_semantics = [#tpu.dimension_semantics<parallel>, #tpu.dimension_semantics<parallel>], iteration_bounds = array<i64: 2, 2>, scalar_prefetch = 0 : i64, scratch_operands = 0 : i64, tpu.core_type = #tpu.core_type<tc>, window_params = [{transform_indices = @transform_0, window_bounds = array<i64: 128, 1024>}, {transform_indices = @transform_1, window_bounds = array<i64: 1, 1024, 64>}, {transform_indices = @transform_2, window_bounds = array<i64: 1, 128, 64>}]} {
    %c0 = arith.constant 0 : index
    %c0_0 = arith.constant 0 : index
    %0 = vector.load %arg2[%c0, %c0_0] : memref<128x1024xf32, #tpu.memory_space<vmem>>, vector<128x1024xf32>
    %c0_1 = arith.constant 0 : index
    %c0_2 = arith.constant 0 : index
    %c0_3 = arith.constant 0 : index
    %1 = vector.load %arg3[%c0_1, %c0_2, %c0_3] : memref<1x1024x64xf32, #tpu.memory_space<vmem>>, vector<1x1024x64xf32>
    %2 = vector.shape_cast %1 : vector<1x1024x64xf32> to vector<1024x64xf32>
    %cst = arith.constant dense<0.000000e+00> : vector<128x64xf32>
    %3 = tpu.matmul %0, %2, %cst {dimension_numbers = #tpu.dot_dimension_numbers<[1], [0], [0], [1], [0, 0, 1, 1], [], []>} : vector<128x1024xf32>, vector<1024x64xf32>, vector<128x64xf32> -> vector<128x64xf32>
    %c0_4 = arith.constant 0 : index
    %c0_5 = arith.constant 0 : index
    %c0_6 = arith.constant 0 : index
    %4 = vector.load %arg4[%c0_4, %c0_5, %c0_6] : memref<1x128x64xf32, #tpu.memory_space<vmem>>, vector<1x128x64xf32>
    %5 = vector.shape_cast %4 : vector<1x128x64xf32> to vector<128x64xf32>
    %6 = vector.shape_cast %3 : vector<128x64xf32> to vector<1x128x64xf32>
    tpu.vector_store %arg4[%c0_4, %c0_5, %c0_6], %6 {strides = array<i32>} : memref<1x128x64xf32, #tpu.memory_space<vmem>>, vector<1x128x64xf32>,
    return
  }
  func.func @transform_0(%arg0: i32, %arg1: i32) -> (i32, i32) {
    %c0_i32 = arith.constant 0 : i32
    %c0_i32_0 = arith.constant 0 : i32
    return %arg1, %c0_i32 : i32, i32
  }
  func.func @transform_1(%arg0: i32, %arg1: i32) -> (i32, i32, i32) {
    %c0_i32 = arith.constant 0 : i32
    %c0_i32_0 = arith.constant 0 : i32
    %c0_i32_1 = arith.constant 0 : i32
    return %arg0, %c0_i32, %c0_i32_0 : i32, i32, i32
  }
  func.func @transform_2(%arg0: i32, %arg1: i32) -> (i32, i32, i32) {
    %c0_i32 = arith.constant 0 : i32
    %c0_i32_0 = arith.constant 0 : i32
    return %arg0, %arg1, %c0_i32 : i32, i32, i32
  }
}

</mosaic_0001>

<bundles_post_ra>
// kernel: tpu_custom_call.1
= control target key start
LH: loop header
LB: loop body
LE: loop exit
PB: predicated region body
PF: predicated region fallthrough
CT: control target
= control target key end

     0   :  { %s1701_s9 = smov 0   ;;  %s1703_s10 = smov 0   ;;  %s2118_s0 = inlined_call_operand.vmem [shape: f32[256,1024], index: 0, kind: input, shape index: {}]   ;;  %s2119_s1 = inlined_call_operand.vmem [shape: f32[2,1024,64], index: 1, kind: input, shape index: {}]   ;;  %s2120_s2 = inlined_call_operand.vmem [shape: f32[2,256,64], index: 2, kind: output, shape index: {}]  }
   0x1   :  { %s1705_s11 = smov 0   ;;  %s1707_s12 = smov 0  }
   0x2   :  { %s1709_s13 = smov 0  }
   0x3 LB: > { %s21_s14 = sadd.s32 1, %s1676_s11  ;;  %s24_s15 = sadd.s32 1, %s1680_s12  ;;  %s1684_s13 = sphi %s1709_s13, %s12_s13   ;;  %s1680_s12 = sphi %s1707_s12, %s2125_s12   ;;  %s1676_s11 = sphi %s1705_s11, %s2124_s11   ;;  %s1672_s10 = sphi %s1703_s10, %s2123_s10   ;;  %s1668_s9 = sphi %s1701_s9, %s2122_s9  }
   0x4   : > { %p22_p0 = scmp.ge.s32.totalorder %s21_s14, 2  ;;  %p1145_p1 = scmp.ge.s32.totalorder %s1684_s13, 1 }
   0x5   : > { %p138_p2 = scmp.lt.s32.totalorder %s1684_s13, 5 }
   0x6   : > { %s2127_s14 = smov (%p22_p0, %s21_s14), 0  ;;  %s2129_s15 = smov (!%p22_p0, %s24_s15), %s1680_s12 }
   0x7   : > { %p139_p3 = pnand %p1145_p1, %p138_p2  ;;  %p26_p4 = scmp.ge.s32.totalorder %s2129_s15, 2 }
   0x8   : > { %p177_p5 = scmp.lt.s32.totalorder (!%p139_p3), %s1672_s10, 1  ;;  %s1146_s20 = sshll.u32 (!%p139_p3), %s1668_s9, 4  ;;  %vm1028_vm0 = vcmask (!%p139_p3), 523264  }
   0x9   : > { %s2131_s15 = smov (%p26_p4, %s2129_s15), 0  ;;  %142 = sbr.rel (%p139_p3) target bundleno = 399 (0x18f), region = 28 }
   0xa   : > { %p1768_p6 = scmp.lt.s32.totalorder (!%p139_p3), %s1146_s20, 31 }
  0x10   : > { %s2133_s10 = smov (!%p177_p5, %s1672_s10), 1  ;;  %s2135_s20 = smov (!%p1768_p6, %s1146_s20), 31 }
  0x11   : > { %s1157_s16 = sshll.u32 %s2133_s10, 10  ;;  %s1156_s22 = sshll.u32 %s2135_s20, 6 }
  0x12   : > { %s1739_s19 = scalar_lea.vmem %s2119_s1, %s1157_s16  ;;  %s1808_s25 = scalar_lea.vmem %s2118_s0, %s1156_s22 }
  0x13   : > { %v336_v0 = vld [vmem:[%s1739_s19 + $0x80] sm:$0xff]  ;;  %v337_v1 = vld [vmem:[%s1739_s19 + $0x88] sm:$0xff]  ;;  %v338_v11 = vld [vmem:[%s1739_s19 + $0x90] sm:$0xff]  ;;  %s1152_s26 = sshll.u32 %s2133_s10, 5 }
  0x14   : > { %v368_v2 = vld [vmem:[%s1739_s19 + $0x180] sm:$0xff]  ;;  %v1478_v3 = vpack.c.bf16 %v337_v1, %v336_v0  ;;  %v369_v4 = vld [vmem:[%s1739_s19 + $0x188] sm:$0xff]  ;;  %v339_v13 = vld [vmem:[%s1739_s19 + $0x98] sm:$0xff]  ;;  %s188_s27 = sadd.s32 %s1152_s26, %s2135_s20 }
  0x15   : > { %v320_v5 = vld [vmem:[%s1739_s19] sm:$0xff]  ;;  %v321_v6 = vld [vmem:[%s1739_s19 + $0x8] sm:$0xff]  ;;  %v1510_v7 = vpack.c.bf16 %v369_v4, %v368_v2  ;;  %v370_v14 = vld [vmem:[%s1739_s19 + $0x190] sm:$0xff]  ;;  %v1482_v16 = vpack.c.bf16 %v339_v13, %v338_v11  ;;  %s1153_s28 = sshll.u32 %s188_s27, 3 }
  0x16   : > { %v1480_v8 = vpack.c.bf16 %v321_v6, %v320_v5  ;;  %v352_v9 = vld [vmem:[%s1739_s19 + $0x100] sm:$0xff]  ;;  %v353_v10 = vld [vmem:[%s1739_s19 + $0x108] sm:$0xff]  ;;  %1479 = vmatprep.subr.bf16.mxu0 %v1478_v3  ;;  %v371_v15 = vld [vmem:[%s1739_s19 + $0x198] sm:$0xff]  ;;  %s2054_s3 = scalar_lea.vmem %s2120_s2, %s1153_s28 }
  0x17   : > { %v1512_v12 = vpack.c.bf16 %v353_v10, %v352_v9  ;;  %1511 = vmatprep.subr.bf16.mxu1 %v1510_v7  ;;  %v1514_v17 = vpack.c.bf16 %v371_v15, %v370_v14  ;;  %v322_v18 = vld [vmem:[%s1739_s19 + $0x10] sm:$0xff]  ;;  %v323_v19 = vld [vmem:[%s1739_s19 + $0x18] sm:$0xff]  ;;  %v340_v23 = vld [vmem:[%s1739_s19 + $0xa0] sm:$0xff] }
  0x18   : > { %1481 = vmatpush3.bf16.msra.mxu0 %v1480_v8  ;;  %v354_v20 = vld [vmem:[%s1739_s19 + $0x110] sm:$0xff]  ;;  %v1484_v21 = vpack.c.bf16 %v323_v19, %v322_v18  ;;  %v355_v22 = vld [vmem:[%s1739_s19 + $0x118] sm:$0xff]  ;;  %v341_v24 = vld [vmem:[%s1739_s19 + $0xa8] sm:$0xff] }
  0x19   : > { %1513 = vmatpush3.bf16.msra.mxu1 %v1512_v12  ;;  %1483 = vmatprep.subr.bf16.mxu0 %v1482_v16  ;;  %v1516_v25 = vpack.c.bf16 %v355_v22, %v354_v20  ;;  %v1486_v26 = vpack.c.bf16 %v341_v24, %v340_v23  ;;  %v372_v27 = vld [vmem:[%s1739_s19 + $0x1a0] sm:$0xff]  ;;  %v373_v28 = vld [vmem:[%s1739_s19 + $0x1a8] sm:$0xff]  ;;  %v342_v35 = vld [vmem:[%s1739_s19 + $0xb0] sm:$0xff] }
  0x1a   : > { %1515 = vmatprep.subr.bf16.mxu1 %v1514_v17  ;;  %v324_v29 = vld [vmem:[%s1739_s19 + $0x20] sm:$0xff]  ;;  %v1518_v30 = vpack.c.bf16 %v373_v28, %v372_v27  ;;  %v325_v31 = vld [vmem:[%s1739_s19 + $0x28] sm:$0xff]  ;;  %v343_v36 = vld [vmem:[%s1739_s19 + $0xb8] sm:$0xff] }
  0x1b   : > { %v356_v32 = vld [vmem:[%s1739_s19 + $0x120] sm:$0xff]  ;;  %v357_v33 = vld [vmem:[%s1739_s19 + $0x128] sm:$0xff]  ;;  %v1488_v34 = vpack.c.bf16 %v325_v31, %v324_v29  ;;  %v374_v37 = vld [vmem:[%s1739_s19 + $0x1b0] sm:$0xff]  ;;  %v1490_v39 = vpack.c.bf16 %v343_v36, %v342_v35 }
  0x1c   : > { %1485 = vmatpush3.bf16.msra.mxu0 %v1484_v21  ;;  %v1520_v38 = vpack.c.bf16 %v357_v33, %v356_v32  ;;  %v375_v40 = vld [vmem:[%s1739_s19 + $0x1b8] sm:$0xff]  ;;  %v326_v41 = vld [vmem:[%s1739_s19 + $0x30] sm:$0xff]  ;;  %v344_v46 = vld [vmem:[%s1739_s19 + $0xc0] sm:$0xff] }
  0x1d   : > { %1517 = vmatpush3.bf16.msra.mxu1 %v1516_v25  ;;  %1487 = vmatprep.subr.bf16.mxu0 %v1486_v26  ;;  %v327_v42 = vld [vmem:[%s1739_s19 + $0x38] sm:$0xff]  ;;  %v1522_v43 = vpack.c.bf16 %v375_v40, %v374_v37  ;;  %v358_v44 = vld [vmem:[%s1739_s19 + $0x130] sm:$0xff]  ;;  %v345_v47 = vld [vmem:[%s1739_s19 + $0xc8] sm:$0xff] }
  0x1e   : > { %1519 = vmatprep.subr.bf16.mxu1 %v1518_v30  ;;  %v359_v45 = vld [vmem:[%s1739_s19 + $0x138] sm:$0xff]  ;;  %v376_v48 = vld [vmem:[%s1739_s19 + $0x1c0] sm:$0xff]  ;;  %v377_v49 = vld [vmem:[%s1739_s19 + $0x1c8] sm:$0xff]  ;;  %v1492_v50 = vpack.c.bf16 %v327_v42, %v326_v41  ;;  %v1494_v52 = vpack.c.bf16 %v345_v47, %v344_v46 }
  0x1f   : > { %v1524_v51 = vpack.c.bf16 %v359_v45, %v358_v44  ;;  %v328_v53 = vld [vmem:[%s1739_s19 + $0x40] sm:$0xff]  ;;  %v329_v54 = vld [vmem:[%s1739_s19 + $0x48] sm:$0xff]  ;;  %v1526_v56 = vpack.c.bf16 %v377_v49, %v376_v48  ;;  %v346_v58 = vld [vmem:[%s1739_s19 + $0xd0] sm:$0xff] }
  0x20   : > { %1489 = vmatpush3.bf16.msra.mxu0 %v1488_v34  ;;  %v360_v55 = vld [vmem:[%s1739_s19 + $0x140] sm:$0xff]  ;;  %v361_v57 = vld [vmem:[%s1739_s19 + $0x148] sm:$0xff]  ;;  %v347_v59 = vld [vmem:[%s1739_s19 + $0xd8] sm:$0xff]  ;;  %v1496_v62 = vpack.c.bf16 %v329_v54, %v328_v53 }
  0x21   : > { %1521 = vmatpush3.bf16.msra.mxu1 %v1520_v38  ;;  %1491 = vmatprep.subr.bf16.mxu0 %v1490_v39  ;;  %v378_v60 = vld [vmem:[%s1739_s19 + $0x1d0] sm:$0xff]  ;;  %v379_v61 = vld [vmem:[%s1739_s19 + $0x1d8] sm:$0xff]  ;;  %v1528_v63 = vpack.c.bf16 %v361_v57, %v360_v55  ;;  %v1498_v0 = vpack.c.bf16 %v347_v59, %v346_v58  ;;  %v348_v6 = vld [vmem:[%s1739_s19 + $0xe0] sm:$0xff] }
  0x22   : > { %1523 = vmatprep.subr.bf16.mxu1 %v1522_v43  ;;  %v330_v1 = vld [vmem:[%s1739_s19 + $0x50] sm:$0xff]  ;;  %v331_v2 = vld [vmem:[%s1739_s19 + $0x58] sm:$0xff]  ;;  %v1530_v4 = vpack.c.bf16 %v379_v61, %v378_v60  ;;  %v349_v7 = vld [vmem:[%s1739_s19 + $0xe8] sm:$0xff] }
  0x23   : > { %v362_v3 = vld [vmem:[%s1739_s19 + $0x150] sm:$0xff]  ;;  %v363_v5 = vld [vmem:[%s1739_s19 + $0x158] sm:$0xff]  ;;  %v380_v8 = vld [vmem:[%s1739_s19 + $0x1e0] sm:$0xff]  ;;  %v1500_v10 = vpack.c.bf16 %v331_v2, %v330_v1  ;;  %v1502_v14 = vpack.c.bf16 %v349_v7, %v348_v6 }
  0x24   : > { %1493 = vmatpush3.bf16.msra.mxu0 %v1492_v50  ;;  %v381_v9 = vld [vmem:[%s1739_s19 + $0x1e8] sm:$0xff]  ;;  %v332_v11 = vld [vmem:[%s1739_s19 + $0x60] sm:$0xff]  ;;  %v1532_v13 = vpack.c.bf16 %v363_v5, %v362_v3  ;;  %v195_v17 = vld [vmem:[%s1808_s25 + $0x18] sm:$0xff] }
  0x25   : > { %1525 = vmatpush3.bf16.msra.mxu1 %v1524_v51  ;;  %1495 = vmatprep.subr.bf16.mxu0 %v1494_v52  ;;  %v333_v12 = vld [vmem:[%s1739_s19 + $0x68] sm:$0xff]  ;;  %v364_v15 = vld [vmem:[%s1739_s19 + $0x160] sm:$0xff]  ;;  %v1534_v18 = vpack.c.bf16 %v381_v9, %v380_v8  ;;  %v350_v20 = vld [vmem:[%s1739_s19 + $0xf0] sm:$0xff] }
  0x26   : > { %1527 = vmatprep.subr.bf16.mxu1 %v1526_v56  ;;  %v193_v16 = vld [vmem:[%s1808_s25 + $0x8] sm:$0xff]  ;;  %v351_v21 = vld [vmem:[%s1739_s19 + $0xf8] sm:$0xff]  ;;  %v382_v22 = vld [vmem:[%s1739_s19 + $0x1f0] sm:$0xff]  ;;  %657 = vmatprep.mubr.f32.mxu1 %v195_v17  ;;  %v1504_v24 = vpack.c.bf16 %v333_v12, %v332_v11 }
  0x27   : > { %v365_v19 = vld [vmem:[%s1739_s19 + $0x168] sm:$0xff]  ;;  %512 = vmatprep.mubr.f32.mxu0 %v193_v16  ;;  %v383_v23 = vld [vmem:[%s1739_s19 + $0x1f8] sm:$0xff]  ;;  %v1506_v26 = vpack.c.bf16 %v351_v21, %v350_v20  ;;  %v334_v27 = vld [vmem:[%s1739_s19 + $0x70] sm:$0xff] }
  0x28   : > { %1497 = vmatpush3.bf16.msra.mxu0 %v1496_v62  ;;  %v1536_v25 = vpack.c.bf16 %v365_v19, %v364_v15  ;;  %v335_v28 = vld [vmem:[%s1739_s19 + $0x78] sm:$0xff]  ;;  %v366_v29 = vld [vmem:[%s1739_s19 + $0x170] sm:$0xff]  ;;  %v1538_v30 = vpack.c.bf16 %v383_v23, %v382_v22  ;;  %v400_v32 = vld [vmem:[%s1739_s19 + $0x280] sm:$0xff] }
  0x29   : > { %1529 = vmatpush3.bf16.msra.mxu1 %v1528_v63  ;;  %1499 = vmatprep.subr.bf16.mxu0 %v1498_v0  ;;  %v367_v31 = vld [vmem:[%s1739_s19 + $0x178] sm:$0xff]  ;;  %v401_v33 = vld [vmem:[%s1739_s19 + $0x288] sm:$0xff]  ;;  %v432_v34 = vld [vmem:[%s1739_s19 + $0x380] sm:$0xff]  ;;  %v1508_v36 = vpack.c.bf16 %v335_v28, %v334_v27 }
  0x2a   : > { %1531 = vmatprep.subr.bf16.mxu1 %v1530_v4  ;;  %v433_v35 = vld [vmem:[%s1739_s19 + $0x388] sm:$0xff]  ;;  %v1540_v37 = vpack.c.bf16 %v367_v31, %v366_v29  ;;  %v1542_v38 = vpack.c.bf16 %v401_v33, %v400_v32  ;;  %v384_v39 = vld [vmem:[%s1739_s19 + $0x200] sm:$0xff]  ;;  %v402_v44 = vld [vmem:[%s1739_s19 + $0x290] sm:$0xff] }
  0x2b   : > { %v385_v40 = vld [vmem:[%s1739_s19 + $0x208] sm:$0xff]  ;;  %v1574_v41 = vpack.c.bf16 %v433_v35, %v432_v34  ;;  %v416_v42 = vld [vmem:[%s1739_s19 + $0x300] sm:$0xff]  ;;  %v403_v45 = vld [vmem:[%s1739_s19 + $0x298] sm:$0xff] }
  0x2c   : > { %1501 = vmatpush3.bf16.msra.mxu0 %v1500_v10  ;;  %v417_v43 = vld [vmem:[%s1739_s19 + $0x308] sm:$0xff]  ;;  %v192_v46 = vld [vmem:[%s1808_s25] sm:$0xff]  ;;  %v1544_v47 = vpack.c.bf16 %v385_v40, %v384_v39  ;;  %v434_v48 = vld [vmem:[%s1739_s19 + $0x390] sm:$0xff]  ;;  %v1546_v54 = vpack.c.bf16 %v403_v45, %v402_v44 }
  0x2d   : > { %1533 = vmatpush3.bf16.msra.mxu1 %v1532_v13  ;;  %1503 = vmatprep.subr.bf16.mxu0 %v1502_v14  ;;  %v435_v49 = vld [vmem:[%s1739_s19 + $0x398] sm:$0xff]  ;;  %v194_v50 = vld [vmem:[%s1808_s25 + $0x10] sm:$0xff]  ;;  %v201_v51 = vld [vmem:[%s1808_s25 + $0x48] sm:$0xff]  ;;  %v1576_v53 = vpack.c.bf16 %v417_v43, %v416_v42 }
  0x2e   : > { %1535 = vmatprep.subr.bf16.mxu1 %v1534_v18  ;;  %v203_v52 = vld [vmem:[%s1808_s25 + $0x58] sm:$0xff]  ;;  %v386_v55 = vld [vmem:[%s1739_s19 + $0x210] sm:$0xff]  ;;  %v1578_v58 = vpack.c.bf16 %v435_v49, %v434_v48  ;;  %v404_v60 = vld [vmem:[%s1739_s19 + $0x2a0] sm:$0xff] }
  0x2f   : > { %v387_v56 = vld [vmem:[%s1739_s19 + $0x218] sm:$0xff]  ;;  %v418_v57 = vld [vmem:[%s1739_s19 + $0x310] sm:$0xff]  ;;  %v405_v61 = vld [vmem:[%s1739_s19 + $0x2a8] sm:$0xff] }
  0x30   : > { %1505 = vmatpush3.bf16.msra.mxu0 %v1504_v24  ;;  %v419_v59 = vld [vmem:[%s1739_s19 + $0x318] sm:$0xff]  ;;  %v200_v62 = vld [vmem:[%s1808_s25 + $0x40] sm:$0xff]  ;;  %v437_v0 = vld [vmem:[%s1739_s19 + $0x3a8] sm:$0xff]  ;;  %v1548_v4 = vpack.c.bf16 %v387_v56, %v386_v55  ;;  %v1550_v6 = vpack.c.bf16 %v405_v61, %v404_v60 }
  0x31   : > { %1537 = vmatpush3.bf16.msra.mxu1 %v1536_v25  ;;  %1507 = vmatprep.subr.bf16.mxu0 %v1506_v26  ;;  %v436_v63 = vld [vmem:[%s1739_s19 + $0x3a0] sm:$0xff]  ;;  %v202_v1 = vld [vmem:[%s1808_s25 + $0x50] sm:$0xff]  ;;  %v209_v2 = vld [vmem:[%s1808_s25 + $0x88] sm:$0xff]  ;;  %v1580_v5 = vpack.c.bf16 %v419_v59, %v418_v57 }
  0x32   : > { %1539 = vmatprep.subr.bf16.mxu1 %v1538_v30  ;;  %v211_v3 = vld [vmem:[%s1808_s25 + $0x98] sm:$0xff]  ;;  %v388_v7 = vld [vmem:[%s1739_s19 + $0x220] sm:$0xff]  ;;  %v389_v8 = vld [vmem:[%s1739_s19 + $0x228] sm:$0xff]  ;;  %v1582_v10 = vpack.c.bf16 %v437_v0, %v436_v63 }
  0x33   : > { %v420_v9 = vld [vmem:[%s1739_s19 + $0x320] sm:$0xff]  ;;  %v421_v11 = vld [vmem:[%s1739_s19 + $0x328] sm:$0xff]  ;;  %v406_v12 = vld [vmem:[%s1739_s19 + $0x2b0] sm:$0xff]  ;;  %v1552_v19 = vpack.c.bf16 %v389_v8, %v388_v7 }
  0x34   : > { %1509 = vmatpush3.bf16.msra.mxu0 %v1508_v36  ;;  %v407_v13 = vld [vmem:[%s1739_s19 + $0x2b8] sm:$0xff]  ;;  %v208_v14 = vld [vmem:[%s1808_s25 + $0x80] sm:$0xff]  ;;  %v438_v15 = vld [vmem:[%s1739_s19 + $0x3b0] sm:$0xff]  ;;  %v1584_v21 = vpack.c.bf16 %v421_v11, %v420_v9 }
  0x35   : > { %1541 = vmatpush3.bf16.msra.mxu1 %v1540_v37  ;;  %1543 = vmatprep.subr.bf16.mxu0 %v1542_v38  ;;  %v439_v16 = vld [vmem:[%s1739_s19 + $0x3b8] sm:$0xff]  ;;  %v210_v17 = vld [vmem:[%s1808_s25 + $0x90] sm:$0xff]  ;;  %v217_v18 = vld [vmem:[%s1808_s25 + $0xc8] sm:$0xff]  ;;  %v1554_v22 = vpack.c.bf16 %v407_v13, %v406_v12 }
  0x36   : > { %1575 = vmatprep.subr.bf16.mxu1 %v1574_v41  ;;  %v219_v20 = vld [vmem:[%s1808_s25 + $0xd8] sm:$0xff]  ;;  %v390_v23 = vld [vmem:[%s1739_s19 + $0x230] sm:$0xff]  ;;  %v216_v25 = vld [vmem:[%s1808_s25 + $0xc0] sm:$0xff]  ;;  %v1586_v26 = vpack.c.bf16 %v439_v16, %v438_v15 }
  0x37   : > { %513 = vmatmul.mubr.f32.vlgmr.msra.gmra.mrb[0].mxu0 %v192_v46  ;;  %v391_v24 = vld [vmem:[%s1739_s19 + $0x238] sm:$0xff]  ;;  %v422_v27 = vld [vmem:[%s1739_s19 + $0x330] sm:$0xff]  ;;  %v408_v30 = vld [vmem:[%s1739_s19 + $0x2c0] sm:$0xff] }
  0x38   : > { %658 = vmatmul.mubr.f32.vlgmr.msra.gmra.mrb[0].mxu1 %v194_v50  ;;  %1545 = vmatpush3.bf16.msra.mxu0 %v1544_v47  ;;  %v423_v28 = vld [vmem:[%s1739_s19 + $0x338] sm:$0xff]  ;;  %v218_v29 = vld [vmem:[%s1808_s25 + $0xd0] sm:$0xff]  ;;  %v409_v31 = vld [vmem:[%s1739_s19 + $0x2c8] sm:$0xff]  ;;  %v1556_v33 = vpack.c.bf16 %v391_v24, %v390_v23 }
  0x39   : > { %517 = vmatprep.mubr.f32.mxu0 %v201_v51  ;;  %662 = vmatprep.mubr.f32.mxu1 %v203_v52  ;;  %v225_v32 = vld [vmem:[%s1808_s25 + $0x108] sm:$0xff]  ;;  %v440_v34 = vld [vmem:[%s1739_s19 + $0x3c0] sm:$0xff]  ;;  %v227_v36 = vld [vmem:[%s1808_s25 + $0x118] sm:$0xff]  ;;  %v1588_v37 = vpack.c.bf16 %v423_v28, %v422_v27  ;;  %v1558_v38 = vpack.c.bf16 %v409_v31, %v408_v30 }
  0x3a   : > { %1577 = vmatpush3.bf16.msra.mxu1 %v1576_v53  ;;  %1547 = vmatprep.subr.bf16.mxu0 %v1546_v54  ;;  %v441_v35 = vld [vmem:[%s1739_s19 + $0x3c8] sm:$0xff]  ;;  %v392_v39 = vld [vmem:[%s1739_s19 + $0x240] sm:$0xff]  ;;  %v226_v45 = vld [vmem:[%s1808_s25 + $0x110] sm:$0xff] }
  0x3b   : > { %518 = vmatmul.mubr.f32.gmra.mrb[2].mxu0 %v200_v62  ;;  %1579 = vmatprep.subr.bf16.mxu1 %v1578_v58  ;;  %v393_v40 = vld [vmem:[%s1739_s19 + $0x248] sm:$0xff]  ;;  %v1590_v41 = vpack.c.bf16 %v441_v35, %v440_v34  ;;  %v424_v42 = vld [vmem:[%s1739_s19 + $0x340] sm:$0xff]  ;;  %v235_v47 = vld [vmem:[%s1808_s25 + $0x158] sm:$0xff] }
  0x3c   : > { %663 = vmatmul.mubr.f32.gmra.mrb[2].mxu1 %v202_v1  ;;  %522 = vmatprep.mubr.f32.mxu0 %v209_v2  ;;  %v425_v43 = vld [vmem:[%s1739_s19 + $0x348] sm:$0xff]  ;;  %v224_v44 = vld [vmem:[%s1808_s25 + $0x100] sm:$0xff]  ;;  %v1560_v48 = vpack.c.bf16 %v393_v40, %v392_v39  ;;  %v410_v49 = vld [vmem:[%s1739_s19 + $0x2d0] sm:$0xff] }
  0x3d   : > { %667 = vmatprep.mubr.f32.mxu1 %v211_v3  ;;  %1549 = vmatpush3.bf16.msra.mxu0 %v1548_v4  ;;  %v233_v46 = vld [vmem:[%s1808_s25 + $0x148] sm:$0xff]  ;;  %v411_v50 = vld [vmem:[%s1739_s19 + $0x2d8] sm:$0xff]  ;;  %v1592_v51 = vpack.c.bf16 %v425_v43, %v424_v42  ;;  %v394_v53 = vld [vmem:[%s1739_s19 + $0x250] sm:$0xff] }
  0x3e   : > { %1581 = vmatpush3.bf16.msra.mxu1 %v1580_v5  ;;  %1551 = vmatprep.subr.bf16.mxu0 %v1550_v6  ;;  %v1562_v52 = vpack.c.bf16 %v411_v50, %v410_v49  ;;  %v395_v54 = vld [vmem:[%s1739_s19 + $0x258] sm:$0xff]  ;;  %v442_v55 = vld [vmem:[%s1739_s19 + $0x3d0] sm:$0xff]  ;;  %v232_v57 = vld [vmem:[%s1808_s25 + $0x140] sm:$0xff] }
  0x3f   : > { %523 = vmatmul.mubr.f32.gmra.mrb[4].mxu0 %v208_v14  ;;  %1583 = vmatprep.subr.bf16.mxu1 %v1582_v10  ;;  %v443_v56 = vld [vmem:[%s1739_s19 + $0x3d8] sm:$0xff]  ;;  %v426_v59 = vld [vmem:[%s1739_s19 + $0x350] sm:$0xff]  ;;  %v241_v62 = vld [vmem:[%s1808_s25 + $0x188] sm:$0xff]  ;;  %v1564_v63 = vpack.c.bf16 %v395_v54, %v394_v53 }
  0x40   : > { %668 = vmatmul.mubr.f32.gmra.mrb[4].mxu1 %v210_v17  ;;  %527 = vmatprep.mubr.f32.mxu0 %v217_v18  ;;  %v1594_v58 = vpack.c.bf16 %v443_v56, %v442_v55  ;;  %v427_v60 = vld [vmem:[%s1739_s19 + $0x358] sm:$0xff]  ;;  %v234_v61 = vld [vmem:[%s1808_s25 + $0x150] sm:$0xff]  ;;  %v240_v1 = vld [vmem:[%s1808_s25 + $0x180] sm:$0xff] }
  0x41   : > { %672 = vmatprep.mubr.f32.mxu1 %v219_v20  ;;  %1553 = vmatpush3.bf16.msra.mxu0 %v1552_v19  ;;  %v243_v0 = vld [vmem:[%s1808_s25 + $0x198] sm:$0xff]  ;;  %v1596_v2 = vpack.c.bf16 %v427_v60, %v426_v59  ;;  %v412_v3 = vld [vmem:[%s1739_s19 + $0x2e0] sm:$0xff]  ;;  %v413_v4 = vld [vmem:[%s1739_s19 + $0x2e8] sm:$0xff] }
  0x42   : > { %1585 = vmatpush3.bf16.msra.mxu1 %v1584_v21  ;;  %1555 = vmatprep.subr.bf16.mxu0 %v1554_v22  ;;  %v396_v5 = vld [vmem:[%s1739_s19 + $0x260] sm:$0xff]  ;;  %v397_v6 = vld [vmem:[%s1739_s19 + $0x268] sm:$0xff]  ;;  %v242_v7 = vld [vmem:[%s1808_s25 + $0x190] sm:$0xff]  ;;  %v1566_v8 = vpack.c.bf16 %v413_v4, %v412_v3 }
  0x43   : > { %528 = vmatmul.mubr.f32.gmra.mrb[6].mxu0 %v216_v25  ;;  %1587 = vmatprep.subr.bf16.mxu1 %v1586_v26  ;;  %v444_v9 = vld [vmem:[%s1739_s19 + $0x3e0] sm:$0xff]  ;;  %v445_v10 = vld [vmem:[%s1739_s19 + $0x3e8] sm:$0xff]  ;;  %v1568_v12 = vpack.c.bf16 %v397_v6, %v396_v5  ;;  %v251_v16 = vld [vmem:[%s1808_s25 + $0x1d8] sm:$0xff] }
  0x44   : > { %673 = vmatmul.mubr.f32.gmra.mrb[6].mxu1 %v218_v29  ;;  %532 = vmatprep.mubr.f32.mxu0 %v225_v32  ;;  %v249_v11 = vld [vmem:[%s1808_s25 + $0x1c8] sm:$0xff]  ;;  %v1598_v13 = vpack.c.bf16 %v445_v10, %v444_v9  ;;  %v428_v14 = vld [vmem:[%s1739_s19 + $0x360] sm:$0xff]  ;;  %v250_v19 = vld [vmem:[%s1808_s25 + $0x1d0] sm:$0xff] }
  0x45   : > { %677 = vmatprep.mubr.f32.mxu1 %v227_v36  ;;  %1557 = vmatpush3.bf16.msra.mxu0 %v1556_v33  ;;  %v429_v15 = vld [vmem:[%s1739_s19 + $0x368] sm:$0xff]  ;;  %v248_v18 = vld [vmem:[%s1808_s25 + $0x1c0] sm:$0xff]  ;;  %v414_v21 = vld [vmem:[%s1739_s19 + $0x2f0] sm:$0xff] }
  0x46   : > { %1589 = vmatpush3.bf16.msra.mxu1 %v1588_v37  ;;  %1559 = vmatprep.subr.bf16.mxu0 %v1558_v38  ;;  %v1600_v17 = vpack.c.bf16 %v429_v15, %v428_v14  ;;  %v257_v20 = vld [vmem:[%s1808_s25 + $0x208] sm:$0xff]  ;;  %v415_v22 = vld [vmem:[%s1739_s19 + $0x2f8] sm:$0xff]  ;;  %v398_v23 = vld [vmem:[%s1739_s19 + $0x270] sm:$0xff] }
  0x47   : > { %533 = vmatmul.mubr.f32.gmra.mrb[8].mxu0 %v224_v44  ;;  %1591 = vmatprep.subr.bf16.mxu1 %v1590_v41  ;;  %v1570_v24 = vpack.c.bf16 %v415_v22, %v414_v21  ;;  %v399_v25 = vld [vmem:[%s1739_s19 + $0x278] sm:$0xff]  ;;  %v446_v26 = vld [vmem:[%s1739_s19 + $0x3f0] sm:$0xff]  ;;  %v256_v33 = vld [vmem:[%s1808_s25 + $0x200] sm:$0xff] }
  0x48   : > { %678 = vmatmul.mubr.f32.gmra.mrb[8].mxu1 %v226_v45  ;;  %537 = vmatprep.mubr.f32.mxu0 %v233_v46  ;;  %v447_v27 = vld [vmem:[%s1739_s19 + $0x3f8] sm:$0xff]  ;;  %v1572_v29 = vpack.c.bf16 %v399_v25, %v398_v23  ;;  %v430_v31 = vld [vmem:[%s1739_s19 + $0x370] sm:$0xff]  ;;  %v265_v36 = vld [vmem:[%s1808_s25 + $0x248] sm:$0xff] }
  0x49   : > { %682 = vmatprep.mubr.f32.mxu1 %v235_v47  ;;  %1561 = vmatpush3.bf16.msra.mxu0 %v1560_v48  ;;  %v259_v28 = vld [vmem:[%s1808_s25 + $0x218] sm:$0xff]  ;;  %v1602_v30 = vpack.c.bf16 %v447_v27, %v446_v26  ;;  %v258_v35 = vld [vmem:[%s1808_s25 + $0x210] sm:$0xff]  ;;  %v264_v38 = vld [vmem:[%s1808_s25 + $0x240] sm:$0xff] }
  0x4a   : > { %1593 = vmatpush3.bf16.msra.mxu1 %v1592_v51  ;;  %1563 = vmatprep.subr.bf16.mxu0 %v1562_v52  ;;  %v431_v32 = vld [vmem:[%s1739_s19 + $0x378] sm:$0xff]  ;;  %v266_v39 = vld [vmem:[%s1808_s25 + $0x250] sm:$0xff]  ;;  %v273_v40 = vld [vmem:[%s1808_s25 + $0x288] sm:$0xff] }
  0x4b   : > { %538 = vmatmul.mubr.f32.gmra.mrb[10].mxu0 %v232_v57  ;;  %1595 = vmatprep.subr.bf16.mxu1 %v1594_v58  ;;  %v1604_v34 = vpack.c.bf16 %v431_v32, %v430_v31  ;;  %v267_v37 = vld [vmem:[%s1808_s25 + $0x258] sm:$0xff]  ;;  %v272_v42 = vld [vmem:[%s1808_s25 + $0x280] sm:$0xff]  ;;  %v274_v43 = vld [vmem:[%s1808_s25 + $0x290] sm:$0xff] }
  0x4c   : > { %683 = vmatmul.mubr.f32.gmra.mrb[10].mxu1 %v234_v61  ;;  %542 = vmatprep.mubr.f32.mxu0 %v241_v62  ;;  %v275_v41 = vld [vmem:[%s1808_s25 + $0x298] sm:$0xff]  ;;  %v281_v44 = vld [vmem:[%s1808_s25 + $0x2c8] sm:$0xff]  ;;  %v280_v46 = vld [vmem:[%s1808_s25 + $0x2c0] sm:$0xff] }
  0x4d   : > { %687 = vmatprep.mubr.f32.mxu1 %v243_v0  ;;  %1565 = vmatpush3.bf16.msra.mxu0 %v1564_v63  ;;  %v283_v45 = vld [vmem:[%s1808_s25 + $0x2d8] sm:$0xff]  ;;  %v282_v47 = vld [vmem:[%s1808_s25 + $0x2d0] sm:$0xff]  ;;  %v289_v48 = vld [vmem:[%s1808_s25 + $0x308] sm:$0xff] }
  0x4e   : > { %1597 = vmatpush3.bf16.msra.mxu1 %v1596_v2  ;;  %1567 = vmatprep.subr.bf16.mxu0 %v1566_v8  ;;  %v291_v49 = vld [vmem:[%s1808_s25 + $0x318] sm:$0xff]  ;;  %v288_v50 = vld [vmem:[%s1808_s25 + $0x300] sm:$0xff]  ;;  %v290_v51 = vld [vmem:[%s1808_s25 + $0x310] sm:$0xff] }
  0x4f   : > { %543 = vmatmul.mubr.f32.gmra.mrb[12].mxu0 %v240_v1  ;;  %1599 = vmatprep.subr.bf16.mxu1 %v1598_v13  ;;  %v297_v52 = vld [vmem:[%s1808_s25 + $0x348] sm:$0xff]  ;;  %v299_v53 = vld [vmem:[%s1808_s25 + $0x358] sm:$0xff]  ;;  %v296_v54 = vld [vmem:[%s1808_s25 + $0x340] sm:$0xff] }
  0x50   : > { %688 = vmatmul.mubr.f32.gmra.mrb[12].mxu1 %v242_v7  ;;  %547 = vmatprep.mubr.f32.mxu0 %v249_v11  ;;  %v298_v55 = vld [vmem:[%s1808_s25 + $0x350] sm:$0xff]  ;;  %v305_v56 = vld [vmem:[%s1808_s25 + $0x388] sm:$0xff]  ;;  %v307_v57 = vld [vmem:[%s1808_s25 + $0x398] sm:$0xff] }
  0x51   : > { %692 = vmatprep.mubr.f32.mxu1 %v251_v16  ;;  %1569 = vmatpush3.bf16.msra.mxu0 %v1568_v12  ;;  %v304_v58 = vld [vmem:[%s1808_s25 + $0x380] sm:$0xff]  ;;  %v306_v59 = vld [vmem:[%s1808_s25 + $0x390] sm:$0xff]  ;;  %v313_v60 = vld [vmem:[%s1808_s25 + $0x3c8] sm:$0xff] }
  0x52   : > { %1601 = vmatpush3.bf16.msra.mxu1 %v1600_v17  ;;  %1571 = vmatprep.subr.bf16.mxu0 %v1570_v24  ;;  %v315_v61 = vld [vmem:[%s1808_s25 + $0x3d8] sm:$0xff]  ;;  %v312_v62 = vld [vmem:[%s1808_s25 + $0x3c0] sm:$0xff]  ;;  %v314_v63 = vld [vmem:[%s1808_s25 + $0x3d0] sm:$0xff] }
  0x53   : > { %548 = vmatmul.mubr.f32.gmra.mrb[14].mxu0 %v248_v18  ;;  %1603 = vmatprep.subr.bf16.mxu1 %v1602_v30  ;;  %v197_v0 = vld [vmem:[%s1808_s25 + $0x28] sm:$0xff]  ;;  %v199_v1 = vld [vmem:[%s1808_s25 + $0x38] sm:$0xff]  ;;  %v196_v2 = vld [vmem:[%s1808_s25 + $0x20] sm:$0xff] }
  0x54   : > { %693 = vmatmul.mubr.f32.gmra.mrb[14].mxu1 %v250_v19  ;;  %552 = vmatprep.mubr.f32.mxu0 %v257_v20  ;;  %v198_v3 = vld [vmem:[%s1808_s25 + $0x30] sm:$0xff]  ;;  %v205_v4 = vld [vmem:[%s1808_s25 + $0x68] sm:$0xff]  ;;  %v207_v5 = vld [vmem:[%s1808_s25 + $0x78] sm:$0xff] }
  0x55   : > { %697 = vmatprep.mubr.f32.mxu1 %v259_v28  ;;  %1573 = vmatpush3.bf16.msra.mxu0 %v1572_v29  ;;  %v204_v6 = vld [vmem:[%s1808_s25 + $0x60] sm:$0xff]  ;;  %v206_v7 = vld [vmem:[%s1808_s25 + $0x70] sm:$0xff]  ;;  %v213_v8 = vld [vmem:[%s1808_s25 + $0xa8] sm:$0xff] }
  0x56   : > { %1605 = vmatpush3.bf16.msra.mxu1 %v1604_v34  ;;  %v215_v9 = vld [vmem:[%s1808_s25 + $0xb8] sm:$0xff]  ;;  %v212_v10 = vld [vmem:[%s1808_s25 + $0xa0] sm:$0xff]  ;;  %v214_v11 = vld [vmem:[%s1808_s25 + $0xb0] sm:$0xff] }
  0x57   : > { %553 = vmatmul.mubr.f32.gmra.mrb[16].mxu0 %v256_v33  ;;  %v221_v12 = vld [vmem:[%s1808_s25 + $0xe8] sm:$0xff]  ;;  %v223_v13 = vld [vmem:[%s1808_s25 + $0xf8] sm:$0xff]  ;;  %v220_v14 = vld [vmem:[%s1808_s25 + $0xe0] sm:$0xff] }
  0x58   : > { %698 = vmatmul.mubr.f32.gmra.mrb[16].mxu1 %v258_v35  ;;  %557 = vmatprep.mubr.f32.mxu0 %v265_v36  ;;  %v222_v15 = vld [vmem:[%s1808_s25 + $0xf0] sm:$0xff]  ;;  %v229_v16 = vld [vmem:[%s1808_s25 + $0x128] sm:$0xff]  ;;  %v231_v17 = vld [vmem:[%s1808_s25 + $0x138] sm:$0xff] }
  0x59   : > { %702 = vmatprep.mubr.f32.mxu1 %v267_v37  ;;  %v228_v18 = vld [vmem:[%s1808_s25 + $0x120] sm:$0xff]  ;;  %v230_v19 = vld [vmem:[%s1808_s25 + $0x130] sm:$0xff]  ;;  %v237_v20 = vld [vmem:[%s1808_s25 + $0x168] sm:$0xff] }
  0x5a   : > { %v239_v21 = vld [vmem:[%s1808_s25 + $0x178] sm:$0xff]  ;;  %v236_v22 = vld [vmem:[%s1808_s25 + $0x160] sm:$0xff]  ;;  %v238_v23 = vld [vmem:[%s1808_s25 + $0x170] sm:$0xff] }
  0x5b   : > { %558 = vmatmul.mubr.f32.gmra.mrb[18].mxu0 %v264_v38  ;;  %v245_v24 = vld [vmem:[%s1808_s25 + $0x1a8] sm:$0xff]  ;;  %v247_v25 = vld [vmem:[%s1808_s25 + $0x1b8] sm:$0xff]  ;;  %v244_v26 = vld [vmem:[%s1808_s25 + $0x1a0] sm:$0xff] }
  0x5c   : > { %703 = vmatmul.mubr.f32.gmra.mrb[18].mxu1 %v266_v39  ;;  %562 = vmatprep.mubr.f32.mxu0 %v273_v40  ;;  %v246_v27 = vld [vmem:[%s1808_s25 + $0x1b0] sm:$0xff]  ;;  %v253_v28 = vld [vmem:[%s1808_s25 + $0x1e8] sm:$0xff]  ;;  %v255_v29 = vld [vmem:[%s1808_s25 + $0x1f8] sm:$0xff] }
  0x5d   : > { %707 = vmatprep.mubr.f32.mxu1 %v275_v41  ;;  %v252_v30 = vld [vmem:[%s1808_s25 + $0x1e0] sm:$0xff]  ;;  %v254_v31 = vld [vmem:[%s1808_s25 + $0x1f0] sm:$0xff]  ;;  %v261_v32 = vld [vmem:[%s1808_s25 + $0x228] sm:$0xff] }
  0x5e   : > { %v263_v33 = vld [vmem:[%s1808_s25 + $0x238] sm:$0xff]  ;;  %v260_v34 = vld [vmem:[%s1808_s25 + $0x220] sm:$0xff]  ;;  %v262_v35 = vld [vmem:[%s1808_s25 + $0x230] sm:$0xff] }
  0x5f   : > { %563 = vmatmul.mubr.f32.gmra.mrb[20].mxu0 %v272_v42  ;;  %v269_v36 = vld [vmem:[%s1808_s25 + $0x268] sm:$0xff]  ;;  %v271_v37 = vld [vmem:[%s1808_s25 + $0x278] sm:$0xff]  ;;  %v268_v38 = vld [vmem:[%s1808_s25 + $0x260] sm:$0xff] }
  0x60   : > { %708 = vmatmul.mubr.f32.gmra.mrb[20].mxu1 %v274_v43  ;;  %567 = vmatprep.mubr.f32.mxu0 %v281_v44  ;;  %v270_v39 = vld [vmem:[%s1808_s25 + $0x270] sm:$0xff]  ;;  %v277_v40 = vld [vmem:[%s1808_s25 + $0x2a8] sm:$0xff]  ;;  %v279_v41 = vld [vmem:[%s1808_s25 + $0x2b8] sm:$0xff] }
  0x61   : > { %712 = vmatprep.mubr.f32.mxu1 %v283_v45  ;;  %v276_v42 = vld [vmem:[%s1808_s25 + $0x2a0] sm:$0xff]  ;;  %v278_v43 = vld [vmem:[%s1808_s25 + $0x2b0] sm:$0xff]  ;;  %v285_v44 = vld [vmem:[%s1808_s25 + $0x2e8] sm:$0xff] }
  0x62   : > { %v287_v45 = vld [vmem:[%s1808_s25 + $0x2f8] sm:$0xff] }
  0x63   : > { %568 = vmatmul.mubr.f32.gmra.mrb[22].mxu0 %v280_v46  ;;  %v284_v46 = vld [vmem:[%s1808_s25 + $0x2e0] sm:$0xff] }
  0x64   : > { %713 = vmatmul.mubr.f32.gmra.mrb[22].mxu1 %v282_v47  ;;  %572 = vmatprep.mubr.f32.mxu0 %v289_v48  ;;  %v286_v47 = vld [vmem:[%s1808_s25 + $0x2f0] sm:$0xff]  ;;  %v293_v48 = vld [vmem:[%s1808_s25 + $0x328] sm:$0xff] }
  0x65   : > { %717 = vmatprep.mubr.f32.mxu1 %v291_v49  ;;  %v295_v49 = vld [vmem:[%s1808_s25 + $0x338] sm:$0xff] }
  0x67   : > { %573 = vmatmul.mubr.f32.gmra.mrb[24].mxu0 %v288_v50  ;;  %v292_v50 = vld [vmem:[%s1808_s25 + $0x320] sm:$0xff] }
  0x68   : > { %718 = vmatmul.mubr.f32.gmra.mrb[24].mxu1 %v290_v51  ;;  %577 = vmatprep.mubr.f32.mxu0 %v297_v52  ;;  %v294_v51 = vld [vmem:[%s1808_s25 + $0x330] sm:$0xff]  ;;  %v301_v52 = vld [vmem:[%s1808_s25 + $0x368] sm:$0xff] }
  0x69   : > { %722 = vmatprep.mubr.f32.mxu1 %v299_v53  ;;  %v303_v53 = vld [vmem:[%s1808_s25 + $0x378] sm:$0xff] }
  0x6b   : > { %578 = vmatmul.mubr.f32.gmra.mrb[26].mxu0 %v296_v54  ;;  %v300_v54 = vld [vmem:[%s1808_s25 + $0x360] sm:$0xff] }
  0x6c   : > { %723 = vmatmul.mubr.f32.gmra.mrb[26].mxu1 %v298_v55  ;;  %582 = vmatprep.mubr.f32.mxu0 %v305_v56  ;;  %v302_v55 = vld [vmem:[%s1808_s25 + $0x370] sm:$0xff]  ;;  %v309_v56 = vld [vmem:[%s1808_s25 + $0x3a8] sm:$0xff] }
  0x6d   : > { %727 = vmatprep.mubr.f32.mxu1 %v307_v57  ;;  %v311_v57 = vld [vmem:[%s1808_s25 + $0x3b8] sm:$0xff] }
  0x6f   : > { %583 = vmatmul.mubr.f32.gmra.mrb[28].mxu0 %v304_v58  ;;  %v308_v58 = vld [vmem:[%s1808_s25 + $0x3a0] sm:$0xff] }
  0x70   : > { %728 = vmatmul.mubr.f32.gmra.mrb[28].mxu1 %v306_v59  ;;  %587 = vmatprep.mubr.f32.mxu0 %v313_v60  ;;  %v310_v59 = vld [vmem:[%s1808_s25 + $0x3b0] sm:$0xff]  ;;  %v317_v60 = vld [vmem:[%s1808_s25 + $0x3e8] sm:$0xff] }
  0x71   : > { %732 = vmatprep.mubr.f32.mxu1 %v315_v61  ;;  %v319_v61 = vld [vmem:[%s1808_s25 + $0x3f8] sm:$0xff] }
  0x73   : > { %588 = vmatmul.mubr.f32.gmra.mrb[30].mxu0 %v312_v62  ;;  %v316_v62 = vld [vmem:[%s1808_s25 + $0x3e0] sm:$0xff] }
  0x74   : > { %733 = vmatmul.mubr.f32.gmra.mrb[30].mxu1 %v314_v63  ;;  %802 = vmatprep.mubr.f32.mxu0 %v197_v0  ;;  %v318_v63 = vld [vmem:[%s1808_s25 + $0x3f0] sm:$0xff] }
  0x75   : > { %947 = vmatprep.mubr.f32.mxu1 %v199_v1 }
  0x77   : > { %803 = vmatmul.mubr.f32.vlgmr.msra.gmra.mrb[32].mxu0 %v196_v2 }
  0x78   : > { %948 = vmatmul.mubr.f32.vlgmr.msra.gmra.mrb[32].mxu1 %v198_v3  ;;  %807 = vmatprep.mubr.f32.mxu0 %v205_v4 }
  0x79   : > { %952 = vmatprep.mubr.f32.mxu1 %v207_v5 }
  0x7b   : > { %808 = vmatmul.mubr.f32.gmra.mrb[34].mxu0 %v204_v6 }
  0x7c   : > { %953 = vmatmul.mubr.f32.gmra.mrb[34].mxu1 %v206_v7  ;;  %812 = vmatprep.mubr.f32.mxu0 %v213_v8 }
  0x7d   : > { %957 = vmatprep.mubr.f32.mxu1 %v215_v9 }
  0x7f   : > { %813 = vmatmul.mubr.f32.gmra.mrb[36].mxu0 %v212_v10 }
  0x80   : > { %958 = vmatmul.mubr.f32.gmra.mrb[36].mxu1 %v214_v11  ;;  %817 = vmatprep.mubr.f32.mxu0 %v221_v12 }
  0x81   : > { %962 = vmatprep.mubr.f32.mxu1 %v223_v13 }
  0x83   : > { %818 = vmatmul.mubr.f32.gmra.mrb[38].mxu0 %v220_v14 }
  0x84   : > { %963 = vmatmul.mubr.f32.gmra.mrb[38].mxu1 %v222_v15  ;;  %822 = vmatprep.mubr.f32.mxu0 %v229_v16 }
  0x85   : > { %967 = vmatprep.mubr.f32.mxu1 %v231_v17 }
  0x87   : > { %823 = vmatmul.mubr.f32.gmra.mrb[40].mxu0 %v228_v18 }
  0x88   : > { %968 = vmatmul.mubr.f32.gmra.mrb[40].mxu1 %v230_v19  ;;  %827 = vmatprep.mubr.f32.mxu0 %v237_v20 }
  0x89   : > { %972 = vmatprep.mubr.f32.mxu1 %v239_v21 }
  0x8b   : > { %828 = vmatmul.mubr.f32.gmra.mrb[42].mxu0 %v236_v22 }
  0x8c   : > { %973 = vmatmul.mubr.f32.gmra.mrb[42].mxu1 %v238_v23  ;;  %832 = vmatprep.mubr.f32.mxu0 %v245_v24 }
  0x8d   : > { %977 = vmatprep.mubr.f32.mxu1 %v247_v25 }
  0x8f   : > { %833 = vmatmul.mubr.f32.gmra.mrb[44].mxu0 %v244_v26 }
  0x90   : > { %978 = vmatmul.mubr.f32.gmra.mrb[44].mxu1 %v246_v27  ;;  %837 = vmatprep.mubr.f32.mxu0 %v253_v28 }
  0x91   : > { %982 = vmatprep.mubr.f32.mxu1 %v255_v29 }
  0x93   : > { %838 = vmatmul.mubr.f32.gmra.mrb[46].mxu0 %v252_v30 }
  0x94   : > { %983 = vmatmul.mubr.f32.gmra.mrb[46].mxu1 %v254_v31  ;;  %842 = vmatprep.mubr.f32.mxu0 %v261_v32 }
  0x95   : > { %987 = vmatprep.mubr.f32.mxu1 %v263_v33 }
  0x97   : > { %843 = vmatmul.mubr.f32.gmra.mrb[48].mxu0 %v260_v34 }
  0x98   : > { %988 = vmatmul.mubr.f32.gmra.mrb[48].mxu1 %v262_v35  ;;  %847 = vmatprep.mubr.f32.mxu0 %v269_v36 }
  0x99   : > { %992 = vmatprep.mubr.f32.mxu1 %v271_v37 }
  0x9b   : > { %848 = vmatmul.mubr.f32.gmra.mrb[50].mxu0 %v268_v38 }
  0x9c   : > { %993 = vmatmul.mubr.f32.gmra.mrb[50].mxu1 %v270_v39  ;;  %852 = vmatprep.mubr.f32.mxu0 %v277_v40 }
  0x9d   : > { %997 = vmatprep.mubr.f32.mxu1 %v279_v41 }
  0x9f   : > { %853 = vmatmul.mubr.f32.gmra.mrb[52].mxu0 %v276_v42 }
  0xa0   : > { %998 = vmatmul.mubr.f32.gmra.mrb[52].mxu1 %v278_v43  ;;  %857 = vmatprep.mubr.f32.mxu0 %v285_v44 }
  0xa1   : > { %1002 = vmatprep.mubr.f32.mxu1 %v287_v45 }
  0xa3   : > { %858 = vmatmul.mubr.f32.gmra.mrb[54].mxu0 %v284_v46 }
  0xa4   : > { %1003 = vmatmul.mubr.f32.gmra.mrb[54].mxu1 %v286_v47  ;;  %862 = vmatprep.mubr.f32.mxu0 %v293_v48 }
  0xa5   : > { %1007 = vmatprep.mubr.f32.mxu1 %v295_v49 }
  0xa7   : > { %863 = vmatmul.mubr.f32.gmra.mrb[56].mxu0 %v292_v50 }
  0xa8   : > { %1008 = vmatmul.mubr.f32.gmra.mrb[56].mxu1 %v294_v51  ;;  %867 = vmatprep.mubr.f32.mxu0 %v301_v52 }
  0xa9   : > { %1012 = vmatprep.mubr.f32.mxu1 %v303_v53 }
  0xab   : > { %868 = vmatmul.mubr.f32.gmra.mrb[58].mxu0 %v300_v54 }
  0xac   : > { %1013 = vmatmul.mubr.f32.gmra.mrb[58].mxu1 %v302_v55  ;;  %872 = vmatprep.mubr.f32.mxu0 %v309_v56 }
  0xad   : > { %1017 = vmatprep.mubr.f32.mxu1 %v311_v57 }
  0xaf   : > { %873 = vmatmul.mubr.f32.gmra.mrb[60].mxu0 %v308_v58 }
  0xb0   : > { %1018 = vmatmul.mubr.f32.gmra.mrb[60].mxu1 %v310_v59  ;;  %877 = vmatprep.mubr.f32.mxu0 %v317_v60 }
  0xb1   : > { %1022 = vmatprep.mubr.f32.mxu1 %v319_v61 }
  0xb3   : > { %878 = vmatmul.mubr.f32.gmra.mrb[62].mxu0 %v316_v62 }
  0xb4   : > { %1023 = vmatmul.mubr.f32.gmra.mrb[62].mxu1 %v318_v63 }
 0x10a   : > { %v1190_v0 = vpop.f32.mrb[0].mxu0 }
 0x10b   : > { %v1270_v1 = vpop.f32.mrb[0].mxu1  ;;  %v1191_v2 = vpop.f32.mrb[1].mxu0 }
 0x10c   : > { %v1192_v3 = vadd.f32 %v1191_v2, %v1190_v0  ;;  %v1271_v4 = vpop.f32.mrb[1].mxu1 }
 0x10d   : > { %v1272_v5 = vadd.f32 %v1271_v4, %v1270_v1 }
 0x10e   : > { %v1193_v6 = vpop.f32.mrb[2].mxu0 }
 0x10f   : > { %v2016_v7 = vadd.f32 %v1272_v5, %v1192_v3  ;;  %v1273_v8 = vpop.f32.mrb[2].mxu1  ;;  %v1194_v9 = vpop.f32.mrb[3].mxu0 }
 0x110   : > { %v1195_v10 = vadd.f32 %v1194_v9, %v1193_v6  ;;  %v1274_v11 = vpop.f32.mrb[3].mxu1 }
 0x111   : > { %v1275_v12 = vadd.f32 %v1274_v11, %v1273_v8 }
 0x112   : > { %v1196_v13 = vpop.f32.mrb[4].mxu0 }
 0x113   : > { %v2018_v14 = vadd.f32 %v1275_v12, %v1195_v10  ;;  %v1276_v15 = vpop.f32.mrb[4].mxu1  ;;  %v1197_v16 = vpop.f32.mrb[5].mxu0 }
 0x114   : > { %v1198_v17 = vadd.f32 %v1197_v16, %v1196_v13  ;;  %v1277_v18 = vpop.f32.mrb[5].mxu1 }
 0x115   : > { %v1278_v19 = vadd.f32 %v1277_v18, %v1276_v15 }
 0x116   : > { %v1199_v20 = vpop.f32.mrb[6].mxu0 }
 0x117   : > { %v2020_v21 = vadd.f32 %v1278_v19, %v1198_v17  ;;  %v1279_v22 = vpop.f32.mrb[6].mxu1  ;;  %v1200_v23 = vpop.f32.mrb[7].mxu0 }
 0x118   : > { %v1201_v24 = vadd.f32 %v1200_v23, %v1199_v20  ;;  %v1280_v25 = vpop.f32.mrb[7].mxu1 }
 0x119   : > { %v1281_v26 = vadd.f32 %v1280_v25, %v1279_v22 }
 0x11a   : > { %v1202_v27 = vpop.f32.mrb[8].mxu0 }
 0x11b   : > { %v2022_v28 = vadd.f32 %v1281_v26, %v1201_v24  ;;  %v1282_v29 = vpop.f32.mrb[8].mxu1  ;;  %v1203_v30 = vpop.f32.mrb[9].mxu0 }
 0x11c   : > { %v1204_v31 = vadd.f32 %v1203_v30, %v1202_v27  ;;  %v1283_v32 = vpop.f32.mrb[9].mxu1 }
 0x11d   : > { %v1284_v33 = vadd.f32 %v1283_v32, %v1282_v29 }
 0x11e   : > { %v1205_v34 = vpop.f32.mrb[10].mxu0 }
 0x11f   : > { %v2024_v35 = vadd.f32 %v1284_v33, %v1204_v31  ;;  %v1285_v36 = vpop.f32.mrb[10].mxu1  ;;  %v1206_v37 = vpop.f32.mrb[11].mxu0 }
 0x120   : > { %v1207_v38 = vadd.f32 %v1206_v37, %v1205_v34  ;;  %v1286_v39 = vpop.f32.mrb[11].mxu1 }
 0x121   : > { %v1287_v40 = vadd.f32 %v1286_v39, %v1285_v36 }
 0x122   : > { %v1208_v41 = vpop.f32.mrb[12].mxu0 }
 0x123   : > { %v2026_v42 = vadd.f32 %v1287_v40, %v1207_v38  ;;  %v1288_v43 = vpop.f32.mrb[12].mxu1  ;;  %v1209_v44 = vpop.f32.mrb[13].mxu0 }
 0x124   : > { %v1210_v45 = vadd.f32 %v1209_v44, %v1208_v41  ;;  %v1289_v46 = vpop.f32.mrb[13].mxu1 }
 0x125   : > { %v1290_v47 = vadd.f32 %v1289_v46, %v1288_v43 }
 0x126   : > { %v1211_v48 = vpop.f32.mrb[14].mxu0 }
 0x127   : > { %v2028_v49 = vadd.f32 %v1290_v47, %v1210_v45  ;;  %v1291_v50 = vpop.f32.mrb[14].mxu1  ;;  %v1212_v51 = vpop.f32.mrb[15].mxu0 }
 0x128   : > { %v1213_v52 = vadd.f32 %v1212_v51, %v1211_v48  ;;  %v1292_v53 = vpop.f32.mrb[15].mxu1 }
 0x129   : > { %v1293_v54 = vadd.f32 %v1292_v53, %v1291_v50 }
 0x12a   : > { %v1214_v55 = vpop.f32.mrb[16].mxu0 }
 0x12b   : > { %v2030_v56 = vadd.f32 %v1293_v54, %v1213_v52  ;;  %v1294_v57 = vpop.f32.mrb[16].mxu1  ;;  %v1215_v58 = vpop.f32.mrb[17].mxu0 }
 0x12c   : > { %v1216_v59 = vadd.f32 %v1215_v58, %v1214_v55  ;;  %v1295_v60 = vpop.f32.mrb[17].mxu1 }
 0x12d   : > { %v1296_v61 = vadd.f32 %v1295_v60, %v1294_v57 }
 0x12e   : > { %v1217_v62 = vpop.f32.mrb[18].mxu0 }
 0x12f   : > { %v2032_v63 = vadd.f32 %v1296_v61, %v1216_v59  ;;  %v1297_v0 = vpop.f32.mrb[18].mxu1  ;;  %v1218_v1 = vpop.f32.mrb[19].mxu0 }
 0x130   : > { %v1219_v2 = vadd.f32 %v1218_v1, %v1217_v62  ;;  %v1298_v3 = vpop.f32.mrb[19].mxu1 }
 0x131   : > { %v1299_v4 = vadd.f32 %v1298_v3, %v1297_v0 }
 0x132   : > { %v1220_v5 = vpop.f32.mrb[20].mxu0 }
 0x133   : > { %v2034_v6 = vadd.f32 %v1299_v4, %v1219_v2  ;;  %v1300_v8 = vpop.f32.mrb[20].mxu1  ;;  %v1221_v9 = vpop.f32.mrb[21].mxu0 }
 0x134   : > { %v1222_v10 = vadd.f32 %v1221_v9, %v1220_v5  ;;  %v1301_v11 = vpop.f32.mrb[21].mxu1 }
 0x135   : > { %v1302_v12 = vadd.f32 %v1301_v11, %v1300_v8 }
 0x136   : > { %v1223_v13 = vpop.f32.mrb[22].mxu0 }
 0x137   : > { %v2036_v15 = vadd.f32 %v1302_v12, %v1222_v10  ;;  %v1303_v16 = vpop.f32.mrb[22].mxu1  ;;  %v1224_v17 = vpop.f32.mrb[23].mxu0 }
 0x138   : > { %v1225_v18 = vadd.f32 %v1224_v17, %v1223_v13  ;;  %v1304_v19 = vpop.f32.mrb[23].mxu1 }
 0x139   : > { %v1305_v20 = vadd.f32 %v1304_v19, %v1303_v16 }
 0x13a   : > { %v1226_v22 = vpop.f32.mrb[24].mxu0 }
 0x13b   : > { %v2038_v23 = vadd.f32 %v1305_v20, %v1225_v18  ;;  %v1306_v24 = vpop.f32.mrb[24].mxu1  ;;  %v1227_v25 = vpop.f32.mrb[25].mxu0 }
 0x13c   : > { %v1228_v26 = vadd.f32 %v1227_v25, %v1226_v22  ;;  %v1307_v27 = vpop.f32.mrb[25].mxu1 }
 0x13d   : > { %v1308_v29 = vadd.f32 %v1307_v27, %v1306_v24 }
 0x13e   : > { %v1229_v30 = vpop.f32.mrb[26].mxu0 }
 0x13f   : > { %v2040_v31 = vadd.f32 %v1308_v29, %v1228_v26  ;;  %v1309_v32 = vpop.f32.mrb[26].mxu1  ;;  %v1230_v33 = vpop.f32.mrb[27].mxu0 }
 0x140   : > { %v1231_v34 = vadd.f32 %v1230_v33, %v1229_v30  ;;  %v1310_v36 = vpop.f32.mrb[27].mxu1 }
 0x141   : > { %v1311_v37 = vadd.f32 %v1310_v36, %v1309_v32 }
 0x142   : > { %v1232_v38 = vpop.f32.mrb[28].mxu0 }
 0x143   : > { %v2042_v39 = vadd.f32 %v1311_v37, %v1231_v34  ;;  %v1312_v40 = vpop.f32.mrb[28].mxu1  ;;  %v1233_v41 = vpop.f32.mrb[29].mxu0 }
 0x144   : > { %v1234_v43 = vadd.f32 %v1233_v41, %v1232_v38  ;;  %v1313_v44 = vpop.f32.mrb[29].mxu1 }
 0x145   : > { %v1314_v45 = vadd.f32 %v1313_v44, %v1312_v40 }
 0x146   : > { %v1235_v46 = vpop.f32.mrb[30].mxu0 }
 0x147   : > { %v2045_v47 = vadd.f32 %v1314_v45, %v1234_v43  ;;  %v1315_v48 = vpop.f32.mrb[30].mxu1  ;;  %v1236_v50 = vpop.f32.mrb[31].mxu0 }
 0x148   : > { %v1237_v51 = vadd.f32 %v1236_v50, %v1235_v46  ;;  %v1316_v52 = vpop.f32.mrb[31].mxu1 }
 0x149   : > { %v1317_v53 = vadd.f32 %v1316_v52, %v1315_v48 }
 0x14a   : > { %v1350_v54 = vpop.f32.mrb[32].mxu0 }
 0x14b   : > { %v2048_v55 = vadd.f32 %v1317_v53, %v1237_v51  ;;  %v1351_v57 = vpop.f32.mrb[33].mxu0  ;;  %v1430_v58 = vpop.f32.mrb[32].mxu1 }
 0x14c   : > { %v1352_v59 = vadd.f32 %v1351_v57, %v1350_v54  ;;  %v1431_v60 = vpop.f32.mrb[33].mxu1 }
 0x14d   : > { %v1432_v61 = vadd.f32 %v1431_v60, %v1430_v58 }
 0x14e   : > { %v805_v62 = vadd.f32 %v1352_v59, %v2016_v7  ;;  %v1353_v0 = vpop.f32.mrb[34].mxu0 }
 0x14f   : > { %v1354_v1 = vpop.f32.mrb[35].mxu0  ;;  %v1433_v2 = vpop.f32.mrb[34].mxu1 }
 0x150   : > { %v950_v3 = vadd.f32 %v1432_v61, %v805_v62  ;;  %v1355_v4 = vadd.f32 %v1354_v1, %v1353_v0  ;;  %v1434_v5 = vpop.f32.mrb[35].mxu1 }
 0x151   : > { %v1435_v8 = vadd.f32 %v1434_v5, %v1433_v2 }
 0x152   : > { %1029 = vst.msk [vmem:[%s2054_s3] sm:$0xff] %vm1028_vm0, %v950_v3  ;;  %v810_v9 = vadd.f32 %v1355_v4, %v2018_v14  ;;  %v1356_v7 = vpop.f32.mrb[36].mxu0 }
 0x153   : > { %v1357_v10 = vpop.f32.mrb[37].mxu0  ;;  %v1436_v11 = vpop.f32.mrb[36].mxu1 }
 0x154   : > { %v955_v12 = vadd.f32 %v1435_v8, %v810_v9  ;;  %v1358_v13 = vadd.f32 %v1357_v10, %v1356_v7  ;;  %v1437_v16 = vpop.f32.mrb[37].mxu1 }
 0x155   : > { %v1438_v17 = vadd.f32 %v1437_v16, %v1436_v11 }
 0x156   : > { %1030 = vst.msk [vmem:[%s2054_s3 + $0x8] sm:$0xff] %vm1028_vm0, %v955_v12  ;;  %v815_v18 = vadd.f32 %v1358_v13, %v2020_v21  ;;  %v1359_v19 = vpop.f32.mrb[38].mxu0 }
 0x157   : > { %v1360_v20 = vpop.f32.mrb[39].mxu0  ;;  %v1439_v22 = vpop.f32.mrb[38].mxu1 }
 0x158   : > { %v960_v24 = vadd.f32 %v1438_v17, %v815_v18  ;;  %v1361_v25 = vadd.f32 %v1360_v20, %v1359_v19  ;;  %v1440_v26 = vpop.f32.mrb[39].mxu1 }
 0x159   : > { %v1441_v14 = vadd.f32 %v1440_v26, %v1439_v22 }
 0x15a   : > { %1031 = vst.msk [vmem:[%s2054_s3 + $0x10] sm:$0xff] %vm1028_vm0, %v960_v24  ;;  %v820_v27 = vadd.f32 %v1361_v25, %v2022_v28  ;;  %v1362_v29 = vpop.f32.mrb[40].mxu0 }
 0x15b   : > { %v1363_v30 = vpop.f32.mrb[41].mxu0  ;;  %v1442_v32 = vpop.f32.mrb[40].mxu1 }
 0x15c   : > { %v965_v33 = vadd.f32 %v1441_v14, %v820_v27  ;;  %v1364_v34 = vadd.f32 %v1363_v30, %v1362_v29  ;;  %v1443_v36 = vpop.f32.mrb[41].mxu1 }
 0x15d   : > { %v1444_v21 = vadd.f32 %v1443_v36, %v1442_v32 }
 0x15e   : > { %1032 = vst.msk [vmem:[%s2054_s3 + $0x18] sm:$0xff] %vm1028_vm0, %v965_v33  ;;  %v825_v37 = vadd.f32 %v1364_v34, %v2024_v35  ;;  %v1365_v38 = vpop.f32.mrb[42].mxu0 }
 0x15f   : > { %v1366_v40 = vpop.f32.mrb[43].mxu0  ;;  %v1445_v41 = vpop.f32.mrb[42].mxu1 }
 0x160   : > { %v970_v43 = vadd.f32 %v1444_v21, %v825_v37  ;;  %v1367_v44 = vadd.f32 %v1366_v40, %v1365_v38  ;;  %v1446_v45 = vpop.f32.mrb[43].mxu1 }
 0x161   : > { %v1447_v28 = vadd.f32 %v1446_v45, %v1445_v41 }
 0x162   : > { %1033 = vst.msk [vmem:[%s2054_s3 + $0x20] sm:$0xff] %vm1028_vm0, %v970_v43  ;;  %v830_v46 = vadd.f32 %v1367_v44, %v2026_v42  ;;  %v1368_v48 = vpop.f32.mrb[44].mxu0 }
 0x163   : > { %v1369_v50 = vpop.f32.mrb[45].mxu0  ;;  %v1448_v51 = vpop.f32.mrb[44].mxu1 }
 0x164   : > { %v975_v52 = vadd.f32 %v1447_v28, %v830_v46  ;;  %v1370_v53 = vadd.f32 %v1369_v50, %v1368_v48  ;;  %v1449_v54 = vpop.f32.mrb[45].mxu1 }
 0x165   : > { %v1450_v35 = vadd.f32 %v1449_v54, %v1448_v51 }
 0x166   : > { %1034 = vst.msk [vmem:[%s2054_s3 + $0x28] sm:$0xff] %vm1028_vm0, %v975_v52  ;;  %v835_v57 = vadd.f32 %v1370_v53, %v2028_v49  ;;  %v1371_v58 = vpop.f32.mrb[46].mxu0 }
 0x167   : > { %v1372_v59 = vpop.f32.mrb[47].mxu0  ;;  %v1451_v60 = vpop.f32.mrb[46].mxu1 }
 0x168   : > { %v980_v61 = vadd.f32 %v1450_v35, %v835_v57  ;;  %v1373_v62 = vadd.f32 %v1372_v59, %v1371_v58  ;;  %v1452_v0 = vpop.f32.mrb[47].mxu1 }
 0x169   : > { %v1453_v42 = vadd.f32 %v1452_v0, %v1451_v60 }
 0x16a   : > { %1035 = vst.msk [vmem:[%s2054_s3 + $0x30] sm:$0xff] %vm1028_vm0, %v980_v61  ;;  %v840_v1 = vadd.f32 %v1373_v62, %v2030_v56  ;;  %v1374_v2 = vpop.f32.mrb[48].mxu0 }
 0x16b   : > { %v1375_v3 = vpop.f32.mrb[49].mxu0  ;;  %v1454_v4 = vpop.f32.mrb[48].mxu1 }
 0x16c   : > { %v985_v5 = vadd.f32 %v1453_v42, %v840_v1  ;;  %v1376_v8 = vadd.f32 %v1375_v3, %v1374_v2  ;;  %v1455_v9 = vpop.f32.mrb[49].mxu1 }
 0x16d   : > { %v1456_v49 = vadd.f32 %v1455_v9, %v1454_v4 }
 0x16e   : > { %1036 = vst.msk [vmem:[%s2054_s3 + $0x38] sm:$0xff] %vm1028_vm0, %v985_v5  ;;  %v845_v7 = vadd.f32 %v1376_v8, %v2032_v63  ;;  %v1377_v10 = vpop.f32.mrb[50].mxu0 }
 0x16f   : > { %v1378_v11 = vpop.f32.mrb[51].mxu0  ;;  %v1457_v12 = vpop.f32.mrb[50].mxu1 }
 0x170   : > { %v990_v13 = vadd.f32 %v1456_v49, %v845_v7  ;;  %v1379_v16 = vadd.f32 %v1378_v11, %v1377_v10  ;;  %v1458_v17 = vpop.f32.mrb[51].mxu1 }
 0x171   : > { %v1459_v56 = vadd.f32 %v1458_v17, %v1457_v12 }
 0x172   : > { %1037 = vst.msk [vmem:[%s2054_s3 + $0x40] sm:$0xff] %vm1028_vm0, %v990_v13  ;;  %v850_v18 = vadd.f32 %v1379_v16, %v2034_v6  ;;  %v1380_v19 = vpop.f32.mrb[52].mxu0 }
 0x173   : > { %v1381_v20 = vpop.f32.mrb[53].mxu0  ;;  %v1460_v22 = vpop.f32.mrb[52].mxu1 }
 0x174   : > { %v995_v24 = vadd.f32 %v1459_v56, %v850_v18  ;;  %v1382_v25 = vadd.f32 %v1381_v20, %v1380_v19  ;;  %v1461_v26 = vpop.f32.mrb[53].mxu1 }
 0x175   : > { %v1462_v63 = vadd.f32 %v1461_v26, %v1460_v22 }
 0x176   : > { %1038 = vst.msk [vmem:[%s2054_s3 + $0x48] sm:$0xff] %vm1028_vm0, %v995_v24  ;;  %v855_v14 = vadd.f32 %v1382_v25, %v2036_v15  ;;  %v1383_v27 = vpop.f32.mrb[54].mxu0 }
 0x177   : > { %v1384_v29 = vpop.f32.mrb[55].mxu0  ;;  %v1463_v30 = vpop.f32.mrb[54].mxu1 }
 0x178   : > { %v1000_v32 = vadd.f32 %v1462_v63, %v855_v14  ;;  %v1385_v33 = vadd.f32 %v1384_v29, %v1383_v27  ;;  %v1464_v34 = vpop.f32.mrb[55].mxu1 }
 0x179   : > { %v1465_v6 = vadd.f32 %v1464_v34, %v1463_v30 }
 0x17a   : > { %1039 = vst.msk [vmem:[%s2054_s3 + $0x50] sm:$0xff] %vm1028_vm0, %v1000_v32  ;;  %v860_v36 = vadd.f32 %v1385_v33, %v2038_v23  ;;  %v1386_v21 = vpop.f32.mrb[56].mxu0 }
 0x17b   : > { %v1387_v37 = vpop.f32.mrb[57].mxu0  ;;  %v1466_v38 = vpop.f32.mrb[56].mxu1 }
 0x17c   : > { %v1005_v40 = vadd.f32 %v1465_v6, %v860_v36  ;;  %v1388_v41 = vadd.f32 %v1387_v37, %v1386_v21  ;;  %v1467_v43 = vpop.f32.mrb[57].mxu1 }
 0x17d   : > { %v1468_v15 = vadd.f32 %v1467_v43, %v1466_v38 }
 0x17e   : > { %1040 = vst.msk [vmem:[%s2054_s3 + $0x58] sm:$0xff] %vm1028_vm0, %v1005_v40  ;;  %v865_v44 = vadd.f32 %v1388_v41, %v2040_v31  ;;  %v1389_v45 = vpop.f32.mrb[58].mxu0 }
 0x17f   : > { %v1390_v28 = vpop.f32.mrb[59].mxu0  ;;  %v1469_v46 = vpop.f32.mrb[58].mxu1 }
 0x180   : > { %v1010_v48 = vadd.f32 %v1468_v15, %v865_v44  ;;  %v1391_v50 = vadd.f32 %v1390_v28, %v1389_v45  ;;  %v1470_v51 = vpop.f32.mrb[59].mxu1 }
 0x181   : > { %v1471_v23 = vadd.f32 %v1470_v51, %v1469_v46 }
 0x182   : > { %1041 = vst.msk [vmem:[%s2054_s3 + $0x60] sm:$0xff] %vm1028_vm0, %v1010_v48  ;;  %v870_v52 = vadd.f32 %v1391_v50, %v2042_v39  ;;  %v1392_v53 = vpop.f32.mrb[60].mxu0 }
 0x183   : > { %v1393_v54 = vpop.f32.mrb[61].mxu0  ;;  %v1472_v35 = vpop.f32.mrb[60].mxu1 }
 0x184   : > { %v1015_v57 = vadd.f32 %v1471_v23, %v870_v52  ;;  %v1394_v58 = vadd.f32 %v1393_v54, %v1392_v53  ;;  %v1473_v31 = vpop.f32.mrb[61].mxu1 }
 0x185   : > { %v1474_v59 = vadd.f32 %v1473_v31, %v1472_v35 }
 0x186   : > { %1042 = vst.msk [vmem:[%s2054_s3 + $0x68] sm:$0xff] %vm1028_vm0, %v1015_v57  ;;  %v875_v60 = vadd.f32 %v1394_v58, %v2045_v47  ;;  %v1395_v61 = vpop.f32.mrb[62].mxu0 }
 0x187   : > { %v1396_v62 = vpop.f32.mrb[63].mxu0  ;;  %v1475_v0 = vpop.f32.mrb[62].mxu1 }
 0x188   : > { %v1020_v42 = vadd.f32 %v1474_v59, %v875_v60  ;;  %v1397_v1 = vadd.f32 %v1396_v62, %v1395_v61  ;;  %v1476_v2 = vpop.f32.mrb[63].mxu1 }
 0x189   : > { %v1477_v39 = vadd.f32 %v1476_v2, %v1475_v0 }
 0x18a   : > { %1043 = vst.msk [vmem:[%s2054_s3 + $0x70] sm:$0xff] %vm1028_vm0, %v1020_v42  ;;  %v880_v3 = vadd.f32 %v1397_v1, %v2048_v55 }
 0x18c   : > { %v1025_v4 = vadd.f32 %v1477_v39, %v880_v3 }
 0x18e   : > { %1044 = vst.msk [vmem:[%s2054_s3 + $0x78] sm:$0xff] %vm1028_vm0, %v1025_v4 }
 0x18f PF: > { %s12_s13 = sadd.s32 1, %s1684_s13   ;;  %s2122_s9 = smov %s1676_s11 }
 0x190   : > { %p9_p7 = scmp.ge.s32.totalorder %s12_s13, 6   ;;  %s2123_s10 = smov %s1680_s12 }
 0x191   : > { %s2124_s11 = smov %s2127_s14  ;;  %s2125_s12 = smov %s2131_s15 }
 0x192   :  { %11 = sbr.rel (!%p9_p7) target bundleno = 3 (0x3), region = 61 }

</bundles_post_ra>
